<compile_context>
chip_gen: v7x
topology: tpu7x:2x2x1
jax: 0.10.0
libtpu: 0.0.40
codegen_flags: <defaults>
</compile_context>

<pallas_src>
import functools

import jax
import jax.numpy as jnp
from jax.experimental import pallas as pl
from jax.experimental.pallas import tpu as pltpu

LN_EPS = 1e-5


def _round_up(x, m):
    return ((x + m - 1) // m) * m


def _merge_kernel(x0_ref, x1_ref, x2_ref, x3_ref, w_ref, b_ref, o_ref, *, matmul_dtype):
    # x*_ref: (TM, C) each; w_ref: (4C, C2p) in matmul_dtype; b_ref: (1, C2p) f32
    # o_ref: (TM, C2p)
    x = jnp.concatenate(
        [x0_ref[...], x1_ref[...], x2_ref[...], x3_ref[...]], axis=-1
    ).astype(jnp.float32)

    # LayerNorm statistics in f32 (affine is folded into w/b).
    mean = jnp.mean(x, axis=-1, keepdims=True)
    xc = x - mean
    var = jnp.mean(xc * xc, axis=-1, keepdims=True)
    xhat = (xc * jax.lax.rsqrt(var + LN_EPS)).astype(matmul_dtype)

    y = jnp.dot(xhat, w_ref[...], preferred_element_type=jnp.float32)
    y = y + b_ref[...].astype(jnp.float32)
    o_ref[...] = y.astype(o_ref.dtype)


def _merge_pallas(x0, x1, x2, x3, w_folded, bias, *, tile_m, out_dtype):
    """x0..x3: (N, C); w_folded: (4C, C2p); bias: (1, C2p).  Returns (N, C2p)."""
    N, C = x0.shape
    C4, C2p = w_folded.shape

    # Row tile: multiple of 8 sublanes, as big as requested, but keep >= 2
    # grid steps when N allows (v7x megacore) and don't wildly exceed N.
    tm = _round_up(min(tile_m, max(8, -(-N // 2))), 8)
    grid = (pl.cdiv(N, tm),)

    # Explicit VMEM budget: double-buffered input/output streams + weight.
    item_in = x0.dtype.itemsize
    item_w = w_folded.dtype.itemsize
    need = (
        4 * 2 * tm * C * item_in      # four input streams, double buffered
        + 2 * C4 * C2p * item_w       # resident weight (2 pipeline buffers)
        + 2 * C2p * 4                 # bias
        + 2 * tm * C2p * 4            # output tile (f32-sized headroom)
    )
    vmem_limit = int(min(max(2 * need, 32 * 1024 * 1024), 64 * 1024 * 1024))

    row_spec = pl.BlockSpec((tm, C), lambda i: (i, 0))
    kernel = functools.partial(_merge_kernel, matmul_dtype=w_folded.dtype)

    return pl.pallas_call(
        kernel,
        out_shape=jax.ShapeDtypeStruct((N, C2p), out_dtype),
        grid=grid,
        in_specs=[
            row_spec, row_spec, row_spec, row_spec,
            pl.BlockSpec((C4, C2p), lambda i: (0, 0)),
            pl.BlockSpec((1, C2p), lambda i: (0, 0)),
        ],
        out_specs=pl.BlockSpec((tm, C2p), lambda i: (i, 0)),
        compiler_params=pltpu.CompilerParams(
            dimension_semantics=("parallel",),
            vmem_limit_bytes=vmem_limit,
        ),
    )(x0, x1, x2, x3, w_folded, bias)


def patch_merging_forward(x, input_resolution, gamma, beta, w_t, *,
                          tile_m=256, matmul_dtype=jnp.bfloat16):
    """Full PatchMerging forward.

    x: (B, L, C) with L = H*W*D.
    gamma, beta: (4C,) LayerNorm params.
    w_t: (4C, 2C) = transpose of nn.Linear(4C, 2C, bias=False).weight.
    """
    H, W, D = input_resolution
    B, L, C = x.shape
    assert L == H * W * D, "input feature has wrong size"
    assert H % 2 == 0 and W % 2 == 0, "PatchMerging requires even H and W"

    xv = x.reshape(B, H, W, D, C)
    # Same gather as the PyTorch module (all four slices take even-D planes).
    x0 = xv[:, 0::2, 0::2, 0::2, :]
    x1 = xv[:, 1::2, 0::2, 0::2, :]
    x2 = xv[:, 0::2, 1::2, 0::2, :]
    x3 = xv[:, 1::2, 1::2, 0::2, :]
    Bm, Hm, Wm, Dm, _ = x0.shape
    N = Bm * Hm * Wm * Dm
    x0, x1, x2, x3 = (t.reshape(N, C) for t in (x0, x1, x2, x3))

    C4 = 4 * C
    C2 = w_t.shape[1]
    assert w_t.shape[0] == C4, "weight must be (4C, 2C)"

    # Fold the LayerNorm affine into the projection:
    #   y = ((x - mean) * rsqrt(var + eps)) @ (gamma[:, None] * W) + beta @ W
    w_f32 = w_t.astype(jnp.float32)
    w_folded = gamma.astype(jnp.float32)[:, None] * w_f32          # (4C, 2C)
    bias = (beta.astype(jnp.float32) @ w_f32)[None, :]             # (1, 2C)

    # Lane-dense output: pad 2C up to a multiple of 128 (zero columns).
    C2p = _round_up(C2, 128)
    if C2p != C2:
        w_folded = jnp.pad(w_folded, ((0, 0), (0, C2p - C2)))
        bias = jnp.pad(bias, ((0, 0), (0, C2p - C2)))
    w_folded = w_folded.astype(matmul_dtype)

    out = _merge_pallas(x0, x1, x2, x3, w_folded, bias,
                        tile_m=tile_m, out_dtype=x.dtype)          # (N, C2p)
    if C2p != C2:
        out = out[:, :C2]
    return out.reshape(Bm, Hm * Wm * Dm, C2)


def _reference(x, input_resolution, gamma, beta, w_t):
    H, W, D = input_resolution
    B, L, C = x.shape
    xv = x.reshape(B, H, W, D, C)
    x0 = xv[:, 0::2, 0::2, 0::2, :]
    x1 = xv[:, 1::2, 0::2, 0::2, :]
    x2 = xv[:, 0::2, 1::2, 0::2, :]
    x3 = xv[:, 1::2, 1::2, 0::2, :]
    xc = jnp.concatenate([x0, x1, x2, x3], axis=-1)
    xc = xc.reshape(B, -1, 4 * C)
    mean = jnp.mean(xc, axis=-1, keepdims=True)
    var = jnp.mean((xc - mean) ** 2, axis=-1, keepdims=True)
    xn = (xc - mean) / jnp.sqrt(var + LN_EPS) * gamma + beta
    return jnp.einsum("blc,cd->bld", xn, w_t)


if __name__ == "__main__":
    key = jax.random.PRNGKey(0)
    k1, k2, k3, k4 = jax.random.split(key, 4)

    # Small but tile-friendly shapes: dim=64 -> 4C=256, 2C=128 (lane-dense),
    # N = 2 * 4 * 4 * 4 = 128 merged tokens -> 2 grid steps of 64 rows.
    B = 2
    dim = 64
    input_resolution = (8, 8, 8)              # H, W, D
    H, W, D = input_resolution
    L = H * W * D

    x = jax.random.normal(k1, (B, L, dim), dtype=jnp.float32)
    gamma = 1.0 + 0.1 * jax.random.normal(k2, (4 * dim,), dtype=jnp.float32)
    beta = 0.1 * jax.random.normal(k3, (4 * dim,), dtype=jnp.float32)
    # nn.Linear(4*dim, 2*dim, bias=False).weight is (2*dim, 4*dim); pass W^T.
    w = jax.random.normal(k4, (2 * dim, 4 * dim), dtype=jnp.float32) * 0.02
    w_t = w.T                                  # (4*dim, 2*dim)

    fwd = jax.jit(lambda xx, g, b, wt: patch_merging_forward(
        xx, input_resolution, g, b, wt))
    out = jax.block_until_ready(fwd(x, gamma, beta, w_t))

    ref = _reference(x, input_resolution, gamma, beta, w_t)
    assert out.shape == (B, (H // 2) * (W // 2) * ((D + 1) // 2), 2 * dim), out.shape
    # bf16 MXU path: tolerance accounts for bf16 rounding of xhat and W'.
    assert jnp.allclose(out, ref, atol=1e-2, rtol=1e-2), (
        "mismatch vs reference, max abs err = "
        f"{float(jnp.max(jnp.abs(out - ref)))}")

    print("KERNEL_OK")
</pallas_src>

<mosaic_0001>
module attributes {stable_mosaic.version = 11 : i64} {
  func.func @_merge_kernel(%arg0: i32, %arg1: memref<64x64xf32, #tpu.memory_space<vmem>>, %arg2: memref<64x64xf32, #tpu.memory_space<vmem>>, %arg3: memref<64x64xf32, #tpu.memory_space<vmem>>, %arg4: memref<64x64xf32, #tpu.memory_space<vmem>>, %arg5: memref<256x128xbf16, #tpu.memory_space<vmem>>, %arg6: memref<1x128xf32, #tpu.memory_space<vmem>>, %arg7: memref<64x128xf32, #tpu.memory_space<vmem>>) attributes {dimension_semantics = [#tpu.dimension_semantics<parallel>], iteration_bounds = array<i64: 2>, scalar_prefetch = 0 : i64, scratch_operands = 0 : i64, tpu.core_type = #tpu.core_type<tc>, window_params = [{transform_indices = @transform_0, window_bounds = array<i64: 64, 64>}, {transform_indices = @transform_1, window_bounds = array<i64: 64, 64>}, {transform_indices = @transform_2, window_bounds = array<i64: 64, 64>}, {transform_indices = @transform_3, window_bounds = array<i64: 64, 64>}, {pipeline_mode = #tpu.pipeline_mode<synchronous>, transform_indices = @transform_4, window_bounds = array<i64: 256, 128>}, {pipeline_mode = #tpu.pipeline_mode<synchronous>, transform_indices = @transform_5, window_bounds = array<i64: 1, 128>}, {transform_indices = @transform_6, window_bounds = array<i64: 64, 128>}]} {
    %c0 = arith.constant 0 : index
    %c0_0 = arith.constant 0 : index
    %0 = vector.load %arg1[%c0, %c0_0] : memref<64x64xf32, #tpu.memory_space<vmem>>, vector<64x64xf32>
    %c0_1 = arith.constant 0 : index
    %c0_2 = arith.constant 0 : index
    %1 = vector.load %arg2[%c0_1, %c0_2] : memref<64x64xf32, #tpu.memory_space<vmem>>, vector<64x64xf32>
    %c0_3 = arith.constant 0 : index
    %c0_4 = arith.constant 0 : index
    %2 = vector.load %arg3[%c0_3, %c0_4] : memref<64x64xf32, #tpu.memory_space<vmem>>, vector<64x64xf32>
    %c0_5 = arith.constant 0 : index
    %c0_6 = arith.constant 0 : index
    %3 = vector.load %arg4[%c0_5, %c0_6] : memref<64x64xf32, #tpu.memory_space<vmem>>, vector<64x64xf32>
    %4 = tpu.concatenate %0, %1, %2, %3 in 1 : vector<64x64xf32>, vector<64x64xf32>, vector<64x64xf32>, vector<64x64xf32> -> vector<64x256xf32>
    %cst = arith.constant dense<0.000000e+00> : vector<64xf32>
    %5 = vector.multi_reduction <add>, %4, %cst [1] : vector<64x256xf32> to vector<64xf32>
    %6 = vector.shape_cast %5 : vector<64xf32> to vector<64x1xf32>
    %cst_7 = arith.constant 2.560000e+02 : f32
    %7 = vector.broadcast %cst_7 : f32 to vector<64x1xf32>
    %8 = arith.divf %6, %7 : vector<64x1xf32>
    %9 = vector.broadcast %8 : vector<64x1xf32> to vector<64x256xf32>
    %10 = arith.subf %4, %9 : vector<64x256xf32>
    %11 = arith.mulf %10, %10 : vector<64x256xf32>
    %cst_8 = arith.constant dense<0.000000e+00> : vector<64xf32>
    %12 = vector.multi_reduction <add>, %11, %cst_8 [1] : vector<64x256xf32> to vector<64xf32>
    %13 = vector.shape_cast %12 : vector<64xf32> to vector<64x1xf32>
    %cst_9 = arith.constant 2.560000e+02 : f32
    %14 = vector.broadcast %cst_9 : f32 to vector<64x1xf32>
    %15 = arith.divf %13, %14 : vector<64x1xf32>
    %cst_10 = arith.constant 9.99999974E-6 : f32
    %16 = vector.broadcast %cst_10 : f32 to vector<64x1xf32>
    %17 = arith.addf %15, %16 : vector<64x1xf32>
    %18 = math.rsqrt %17 : vector<64x1xf32>
    %19 = vector.broadcast %18 : vector<64x1xf32> to vector<64x256xf32>
    %20 = arith.mulf %10, %19 : vector<64x256xf32>
    %21 = arith.truncf %20 : vector<64x256xf32> to vector<64x256xbf16>
    %c0_11 = arith.constant 0 : index
    %c0_12 = arith.constant 0 : index
    %22 = vector.load %arg5[%c0_11, %c0_12] : memref<256x128xbf16, #tpu.memory_space<vmem>>, vector<256x128xbf16>
    %cst_13 = arith.constant dense<0.000000e+00> : vector<64x128xf32>
    %23 = tpu.matmul %21, %22, %cst_13 {dimension_numbers = #tpu.dot_dimension_numbers<[1], [0], [0], [1], [0, 0, 1, 1], [], []>} : vector<64x256xbf16>, vector<256x128xbf16>, vector<64x128xf32> -> vector<64x128xf32>
    %c0_14 = arith.constant 0 : index
    %c0_15 = arith.constant 0 : index
    %24 = vector.load %arg6[%c0_14, %c0_15] : memref<1x128xf32, #tpu.memory_space<vmem>>, vector<1x128xf32>
    %25 = vector.broadcast %24 : vector<1x128xf32> to vector<64x128xf32>
    %26 = arith.addf %23, %25 : vector<64x128xf32>
    %c0_16 = arith.constant 0 : index
    %c0_17 = arith.constant 0 : index
    %27 = vector.load %arg7[%c0_16, %c0_17] : memref<64x128xf32, #tpu.memory_space<vmem>>, vector<64x128xf32>
    tpu.vector_store %arg7[%c0_16, %c0_17], %26 {strides = array<i32>} : memref<64x128xf32, #tpu.memory_space<vmem>>, vector<64x128xf32>,
    return
  }
  func.func @transform_0(%arg0: i32) -> (i32, i32) {
    %c0_i32 = arith.constant 0 : i32
    %c0_i32_0 = arith.constant 0 : i32
    return %arg0, %c0_i32 : i32, i32
  }
  func.func @transform_1(%arg0: i32) -> (i32, i32) {
    %c0_i32 = arith.constant 0 : i32
    %c0_i32_0 = arith.constant 0 : i32
    return %arg0, %c0_i32 : i32, i32
  }
  func.func @transform_2(%arg0: i32) -> (i32, i32) {
    %c0_i32 = arith.constant 0 : i32
    %c0_i32_0 = arith.constant 0 : i32
    return %arg0, %c0_i32 : i32, i32
  }
  func.func @transform_3(%arg0: i32) -> (i32, i32) {
    %c0_i32 = arith.constant 0 : i32
    %c0_i32_0 = arith.constant 0 : i32
    return %arg0, %c0_i32 : i32, i32
  }
  func.func @transform_4(%arg0: i32) -> (i32, i32) {
    %c0_i32 = arith.constant 0 : i32
    %c0_i32_0 = arith.constant 0 : i32
    %c0_i32_1 = arith.constant 0 : i32
    return %c0_i32, %c0_i32_0 : i32, i32
  }
  func.func @transform_5(%arg0: i32) -> (i32, i32) {
    %c0_i32 = arith.constant 0 : i32
    %c0_i32_0 = arith.constant 0 : i32
    %c0_i32_1 = arith.constant 0 : i32
    return %c0_i32, %c0_i32_0 : i32, i32
  }
  func.func @transform_6(%arg0: i32) -> (i32, i32) {
    %c0_i32 = arith.constant 0 : i32
    %c0_i32_0 = arith.constant 0 : i32
    return %arg0, %c0_i32 : i32, i32
  }
}

</mosaic_0001>

<bundles_post_ra>
// kernel: _lambda_.1
= control target key start
LH: loop header
LB: loop body
LE: loop exit
PB: predicated region body
PF: predicated region fallthrough
CT: control target
= control target key end

     0   :  { %11 = vsyncpa [#allocation3], 0  ;;  %s1538_s0 = inlined_call_operand.vmem [shape: f32[128,64], index: 0, kind: input, shape index: {}]   ;;  %s1539_s1 = inlined_call_operand.vmem [shape: f32[128,64], index: 1, kind: input, shape index: {}]   ;;  %s1540_s2 = inlined_call_operand.vmem [shape: f32[128,64], index: 2, kind: input, shape index: {}]   ;;  %s1541_s3 = inlined_call_operand.vmem [shape: f32[128,64], index: 3, kind: input, shape index: {}]   ;;  %s1542_s4 = inlined_call_operand.vmem [shape: bf16[256,128], index: 4, kind: input, shape index: {}]   ;;  %s1543_s5 = inlined_call_operand.vmem [shape: f32[1,128], index: 5, kind: input, shape index: {}]   ;;  %s1544_s6 = inlined_call_operand.hbm [shape: f32[128,128], index: 6, kind: output, shape index: {}]  }
   0x1   :  { %13 = vsyncpa [#allocation3 + $0x1], 0  ;;  %s1159_s21 = smov 0   ;;  %s1161_s22 = smov 0  }
   0x2   :  { %s1163_s23 = smov 0   ;;  %s1165_s24 = smov 0  }
   0x3 LB: > { %s1180_s25 = sadd.s32 4294967295, %s1118_s24   ;;  %s890_s26 = sadd.s32 4294967294, %s1118_s24   ;;  %s1118_s24 = sphi %s1165_s24, %s1550_s24   ;;  %s1114_s23 = sphi %s1163_s23, %s1549_s23   ;;  %s1110_s22 = sphi %s1161_s22, %s1548_s22   ;;  %s1106_s21 = sphi %s1159_s21, %s1547_s21  }
   0x4   : > { %s1184_s27 = sadd.s32 1, %s1118_s24   ;;  %s172_s28 = sadd.s32 1, %s1114_s23 }
   0x5   : > { %s169_s29 = ssub.s32 %s1118_s24, %s1184_s27  ;;  %p182_p0 = scmp.ne.s32.totalorder %s1114_s23, %s1110_s22 }
   0x6   : > { %p170_p1 = scmp.eq.s32.totalorder %s169_s29, 0  ;;  %p183_p2 = scmp.eq.s32.totalorder %s1180_s25, 1 }
   0x7   : > { %p188_p3 = scmp.ne.s32.totalorder %s1110_s22, %s1106_s21  ;;  %p189_p4 = scmp.eq.s32.totalorder %s890_s26, 1 }
   0x8   : > { %s1195_s30 = scalar_select %p170_p1, %s1114_s23, %s172_s28  }
   0x9   : > { %p1197_p5 = por %p183_p2, %p182_p0  ;;  %p1201_p6 = por %p189_p4, %p188_p3 }
   0xa   : > { %p893_p7 = scmp.ge.s32.totalorder %s1118_s24, 1  ;;  %p249_p8 = scmp.lt.s32.totalorder %s1118_s24, 3 }
   0xc   : > { %p250_p9 = pnand %p893_p7, %p249_p8 }
   0xd   : > { %s895_s9 = sshll.u32 (!%p250_p9), %s1180_s25, 3  ;;  %s1120_s14 = smov (!%p250_p9), 64   ;;  %vm416_vm0 = vcmask (!%p250_p9), 523264  }
   0xe   : > { %253 = sbr.rel (%p250_p9) target bundleno = 719 (0x2cf), region = 44  ;;  %p295_p10 = scmp.lt.s32.totalorder (!%p250_p9), %s895_s9, 15 }
   0xf   : > { %s291_s11 = sand.u32 (!%p250_p9), 1, %s1110_s22   ;;  %s925_s16 = sshll.u32 (!%p250_p9), %s1180_s25, 10 }
  0x10   : > { %s894_s12 = sshll.u32 (!%p250_p9), %s291_s11, 6  ;;  %s1497_s25 = scalar_lea.sflag (!%p250_p9), [#allocation3], %s291_s11 }
  0x11   : > { %s1476_s15 = scalar_lea.vmem (!%p250_p9), [#allocation2], %s894_s12  ;;  %s1121_s28 = smov (!%p250_p9), [#allocation2]  }
  0x15   : > { %s1552_s9 = smov (!%p295_p10, %s895_s9), 15 }
  0x16   : > { %s1208_s10 = sshll.u32 %s1552_s9, 3 }
  0x17   : > { %s304_s13 = scalar_lea.vmem %s1539_s1, %s1208_s10  ;;  %s316_s17 = scalar_lea.vmem %s1541_s3, %s1208_s10 }
  0x18   : > { %v332_v0 = vld [vmem:[%s304_s13 + $0x20] sm:$0xff]  ;;  %v333_v2 = vld [vmem:[%s304_s13 + $0x28] sm:$0xff]  ;;  %v331_v8 = vld [vmem:[%s304_s13 + $0x18] sm:$0xff]  ;;  %s1238_s20 = scalar_lea.vmem %s1538_s0, %s1208_s10  ;;  %s1244_s29 = scalar_lea.vmem %s1540_s2, %s1208_s10 }
  0x19   : > { %v328_v1 = vld [vmem:[%s304_s13] sm:$0xff]  ;;  %368 = vrot.lane.b32.xlu1 %v332_v0, %s1120_s14  ;;  %v329_v3 = vld [vmem:[%s304_s13 + $0x8] sm:$0xff]  ;;  %v330_v9 = vld [vmem:[%s304_s13 + $0x10] sm:$0xff] }
  0x1a   : > { %360 = vrot.lane.b32.xlu0 %v328_v1, %s1120_s14  ;;  %v345_v4 = vld [vmem:[%s316_s17 + $0x8] sm:$0xff]  ;;  %v344_v5 = vld [vmem:[%s316_s17] sm:$0xff]  ;;  %v335_v10 = vld [vmem:[%s304_s13 + $0x38] sm:$0xff] }
  0x1b   : > { %v349_v6 = vld [vmem:[%s316_s17 + $0x28] sm:$0xff]  ;;  %v348_v7 = vld [vmem:[%s316_s17 + $0x20] sm:$0xff]  ;;  %v334_v11 = vld [vmem:[%s304_s13 + $0x30] sm:$0xff] }
  0x1c   : > { %v347_v12 = vld [vmem:[%s316_s17 + $0x18] sm:$0xff]  ;;  %v346_v13 = vld [vmem:[%s316_s17 + $0x10] sm:$0xff]  ;;  %v320_v20 = vld [vmem:[%s1238_s20] sm:$0xff] }
  0x1d   : > { %370 = vrot.lane.b32.xlu1 %v333_v2, %s1120_s14  ;;  %v351_v14 = vld [vmem:[%s316_s17 + $0x38] sm:$0xff]  ;;  %v350_v15 = vld [vmem:[%s316_s17 + $0x30] sm:$0xff]  ;;  %v321_v21 = vld [vmem:[%s1238_s20 + $0x8] sm:$0xff]  ;;  %s792_s17 = sshll.u32 %s1476_s15, 4  ;;  %s1491_s17 = int_to_ptr.vmem [resolvable:$true] %s792_s17 }
  0x1e   : > { %362 = vrot.lane.b32.xlu0 %v329_v3, %s1120_s14  ;;  %v337_v22 = vld [vmem:[%s1244_s29 + $0x8] sm:$0xff]  ;;  %v336_v23 = vld [vmem:[%s1244_s29] sm:$0xff]  ;;  %v323_v48 = vld [vmem:[%s1238_s20 + $0x18] sm:$0xff]  ;;  %s1056_s26 = scalar_lea.vmem %s1491_s17, 1024 }
  0x1f   : > { %v324_v30 = vld [vmem:[%s1238_s20 + $0x20] sm:$0xff]  ;;  %v341_v34 = vld [vmem:[%s1244_s29 + $0x28] sm:$0xff]  ;;  %v322_v49 = vld [vmem:[%s1238_s20 + $0x10] sm:$0xff]  ;;  %p1057_p11 = scmp.ne.s32.totalorder %s1491_s17, %s1056_s26 }
  0x20   : > { %v340_v31 = vld [vmem:[%s1244_s29 + $0x20] sm:$0xff]  ;;  %v325_v39 = vld [vmem:[%s1238_s20 + $0x28] sm:$0xff]  ;;  %v339_v50 = vld [vmem:[%s1244_s29 + $0x18] sm:$0xff] }
  0x21   : > { %394 = vrot.lane.b32.xlu1 %v345_v4, %s1120_s14  ;;  %v338_v51 = vld [vmem:[%s1244_s29 + $0x10] sm:$0xff]  ;;  %v327_v56 = vld [vmem:[%s1238_s20 + $0x38] sm:$0xff]  ;;  %p1058_p12 = pnand %p1057_p11, %p1197_p5 }
  0x22   : > { %392 = vrot.lane.b32.xlu0 %v344_v5, %s1120_s14  ;;  %v326_v59 = vld [vmem:[%s1238_s20 + $0x30] sm:$0xff]  ;;  %v343_v60 = vld [vmem:[%s1244_s29 + $0x38] sm:$0xff]  ;;  %s1489_s20 = scalar_lea.hbm %s1544_s6, %s925_s16 }
  0x23   : > { %v342_v61 = vld [vmem:[%s1244_s29 + $0x30] sm:$0xff]  ;;  %p1059_p13 = pneg %p1058_p12  ;;  %s1060_s29 = sshll.u32 %s1121_s28, 4  ;;  %s1061_s29 = int_to_ptr.vmem [resolvable:$false] %s1060_s29 }
  0x24   : > { %s1062_s9 = scalar_lea.vmem %s1061_s29, 2048  ;;  %p1063_p0 = scmp.lt.s32.totalorder %s1491_s17, %s1061_s29 }
  0x25   : > { %402 = vrot.lane.b32.xlu1 %v349_v6, %s1120_s14  ;;  %p1064_p1 = scmp.lt.s32.totalorder %s1062_s9, %s1056_s26 }
  0x26   : > { %400 = vrot.lane.b32.xlu0 %v348_v7, %s1120_s14 }
  0x27   : > { %p1065_p2 = por %p1064_p1, %p1063_p0 }
  0x29   : > { %366 = vrot.lane.b32.xlu1 %v331_v8, %s1120_s14  ;;  %v1024_v8 = vld [vmem:[%s1542_s4 + $0x40] sm:$0xff]   ;;  %p1066_p3 = pnand %p1065_p2, %p1059_p13 }
  0x2a   : > { %364 = vrot.lane.b32.xlu0 %v330_v9, %s1120_s14  ;;  %v1025_v9 = vld [vmem:[%s1542_s4] sm:$0xff]   ;;  %926 = vmatprep.subr.bf16.mxu0 %v1024_v8 }
  0x2b   : > { %966 = vmatprep.subr.bf16.mxu1 %v1024_v8  ;;  %927 = vmatpush3.bf16.msra.mxu0 %v1025_v9 }
  0x2c   : > { %974 = vmatpush3.bf16.msra.mxu1 %v1025_v9  ;;  %v1033_v9 = vld [vmem:[%s1542_s4 + $0x20] sm:$0xff]  }
  0x2d   : > { %374 = vrot.lane.b32.xlu1 %v335_v10, %s1120_s14  ;;  %v1026_v10 = vld [vmem:[%s1542_s4 + $0x48] sm:$0xff]  }
  0x2e   : > { %372 = vrot.lane.b32.xlu0 %v334_v11, %s1120_s14  ;;  %v1027_v11 = vld [vmem:[%s1542_s4 + $0x8] sm:$0xff]   ;;  %928 = vmatprep.subr.bf16.mxu0 %v1026_v10 }
  0x2f   : > { %967 = vmatprep.subr.bf16.mxu1 %v1026_v10  ;;  %929 = vmatpush3.bf16.msra.mxu0 %v1027_v11  ;;  %v1034_v10 = vld [vmem:[%s1542_s4 + $0x68] sm:$0xff]  }
  0x30   : > { %975 = vmatpush3.bf16.msra.mxu1 %v1027_v11  ;;  %v1035_v11 = vld [vmem:[%s1542_s4 + $0x28] sm:$0xff]  }
  0x31   : > { %398 = vrot.lane.b32.xlu1 %v347_v12, %s1120_s14  ;;  %v1028_v12 = vld [vmem:[%s1542_s4 + $0x50] sm:$0xff]  }
  0x32   : > { %396 = vrot.lane.b32.xlu0 %v346_v13, %s1120_s14  ;;  %v1029_v13 = vld [vmem:[%s1542_s4 + $0x10] sm:$0xff]   ;;  %930 = vmatprep.subr.bf16.mxu0 %v1028_v12 }
  0x33   : > { %968 = vmatprep.subr.bf16.mxu1 %v1028_v12  ;;  %931 = vmatpush3.bf16.msra.mxu0 %v1029_v13  ;;  %v1036_v12 = vld [vmem:[%s1542_s4 + $0x70] sm:$0xff]  }
  0x34   : > { %976 = vmatpush3.bf16.msra.mxu1 %v1029_v13  ;;  %v1037_v13 = vld [vmem:[%s1542_s4 + $0x30] sm:$0xff]  }
  0x35   : > { %406 = vrot.lane.b32.xlu1 %v351_v14, %s1120_s14 }
  0x36   : > { %404 = vrot.lane.b32.xlu0 %v350_v15, %s1120_s14 }
  0x8b   : > { %v369_v16 = vpop.permute.xlu1 %368 }
  0x8c   : > { %v361_v17 = vpop.permute.xlu0 %360  ;;  %v1270_v37 = vsel %vm416_vm0, %v324_v30, %v369_v16 }
  0x8d   : > { %v1251_v26 = vsel %vm416_vm0, %v320_v20, %v361_v17 }
  0x8f   : > { %v371_v18 = vpop.permute.xlu1 %370 }
  0x90   : > { %v363_v19 = vpop.permute.xlu0 %362  ;;  %v1282_v44 = vsel %vm416_vm0, %v325_v39, %v371_v18 }
  0x91   : > { %v1254_v27 = vsel %vm416_vm0, %v321_v21, %v363_v19 }
  0x93   : > { %v395_v24 = vpop.permute.xlu1 %394 }
  0x94   : > { %v393_v25 = vpop.permute.xlu0 %392  ;;  %v1257_v28 = vsel %vm416_vm0, %v337_v22, %v395_v24 }
  0x95   : > { %v1260_v29 = vsel %vm416_vm0, %v336_v23, %v393_v25  ;;  %v436_v32 = vadd.f32 %v1257_v28, %v1254_v27 }
  0x96   : > { %v433_v33 = vadd.f32 %v1260_v29, %v1251_v26 }
  0x97   : > { %v403_v35 = vpop.permute.xlu1 %402  ;;  %437 = vadd.xlane.f32.xlu1 %v436_v32 }
  0x98   : > { %v401_v36 = vpop.permute.xlu0 %400  ;;  %434 = vadd.xlane.f32.xlu0 %v433_v33  ;;  %v1279_v41 = vsel %vm416_vm0, %v341_v34, %v403_v35 }
  0x99   : > { %v1273_v38 = vsel %vm416_vm0, %v340_v31, %v401_v36  ;;  %v448_v45 = vadd.f32 %v1279_v41, %v1282_v44 }
  0x9a   : > { %v445_v40 = vadd.f32 %v1273_v38, %v1270_v37 }
  0x9b   : > { %v367_v42 = vpop.permute.xlu1 %366 }
  0x9c   : > { %v365_v43 = vpop.permute.xlu0 %364  ;;  %446 = vadd.xlane.f32.xlu0 %v445_v40  ;;  %v1291_v54 = vsel %vm416_vm0, %v323_v48, %v367_v42 }
  0x9d   : > { %v1294_v55 = vsel %vm416_vm0, %v322_v49, %v365_v43 }
  0x9f   : > { %v375_v46 = vpop.permute.xlu1 %374 }
  0xa0   : > { %v373_v47 = vpop.permute.xlu0 %372  ;;  %449 = vadd.xlane.f32.xlu0 %v448_v45  ;;  %v1311_v2 = vsel %vm416_vm0, %v327_v56, %v375_v46 }
  0xa1   : > { %v1314_v3 = vsel %vm416_vm0, %v326_v59, %v373_v47 }
  0xa3   : > { %v399_v52 = vpop.permute.xlu1 %398 }
  0xa4   : > { %v397_v53 = vpop.permute.xlu0 %396  ;;  %v1298_v57 = vsel %vm416_vm0, %v339_v50, %v399_v52 }
  0xa5   : > { %v1301_v58 = vsel %vm416_vm0, %v338_v51, %v397_v53  ;;  %v442_v63 = vadd.f32 %v1298_v57, %v1291_v54 }
  0xa6   : > { %v439_v62 = vadd.f32 %v1301_v58, %v1294_v55 }
  0xa7   : > { %v407_v0 = vpop.permute.xlu1 %406  ;;  %443 = vadd.xlane.f32.xlu0 %v442_v63  ;;  %v1031_v63 = vld [vmem:[%s1542_s4 + $0x18] sm:$0xff]  }
  0xa8   : > { %v405_v1 = vpop.permute.xlu0 %404  ;;  %440 = vadd.xlane.f32.xlu1 %v439_v62  ;;  %v1317_v4 = vsel %vm416_vm0, %v343_v60, %v407_v0 }
  0xa9   : > { %v1320_v5 = vsel %vm416_vm0, %v342_v61, %v405_v1  ;;  %v454_v7 = vadd.f32 %v1317_v4, %v1311_v2 }
  0xaa   : > { %v451_v6 = vadd.f32 %v1320_v5, %v1314_v3 }
  0xab   : > { %455 = vadd.xlane.f32.xlu0 %v454_v7 }
  0xac   : > { %452 = vadd.xlane.f32.xlu1 %v451_v6  ;;  %v1032_v6 = vld [vmem:[%s1542_s4 + $0x60] sm:$0xff]  }
 0x124   : > { %v438_v14 = vpop.xlane.xlu1 %437 }
 0x125   : > { %v435_v15 = vpop.xlane.xlu0 %434  ;;  %v459_v16 = vmul.f32 0.00390625, %v438_v14  ;;  %v1038_v14 = vld [vmem:[%s1542_s4 + $0x78] sm:$0xff]  }
 0x126   : > { %v458_v17 = vmul.f32 0.00390625, %v435_v15  ;;  %v1039_v15 = vld [vmem:[%s1542_s4 + $0x38] sm:$0xff]  }
 0x127   : > { %v1345_v18 = vsub.f32 %v1254_v27, %v459_v16  ;;  %v1348_v19 = vsub.f32 %v1257_v28, %v459_v16 }
 0x128   : > { %v1351_v20 = vsub.f32 %v1251_v26, %v458_v17  ;;  %v1354_v21 = vsub.f32 %v1260_v29, %v458_v17 }
 0x129   : > { %v447_v22 = vpop.xlane.xlu0 %446  ;;  %v484_v24 = vmul.f32 %v1345_v18, %v1345_v18  ;;  %v485_v25 = vmul.f32 %v1348_v19, %v1348_v19 }
 0x12a   : > { %v462_v23 = vmul.f32 0.00390625, %v447_v22  ;;  %v482_v27 = vmul.f32 %v1351_v20, %v1351_v20  ;;  %v483_v28 = vmul.f32 %v1354_v21, %v1354_v21 }
 0x12b   : > { %v501_v30 = vadd.f32 %v485_v25, %v484_v24 }
 0x12c   : > { %v1365_v26 = vsub.f32 %v1270_v37, %v462_v23  ;;  %v1368_v29 = vsub.f32 %v1273_v38, %v462_v23  ;;  %v498_v32 = vadd.f32 %v483_v28, %v482_v27 }
 0x12d   : > { %v450_v31 = vpop.xlane.xlu0 %449  ;;  %502 = vadd.xlane.f32.xlu0 %v501_v30 }
 0x12e   : > { %v463_v33 = vmul.f32 0.00390625, %v450_v31  ;;  %v490_v34 = vmul.f32 %v1365_v26, %v1365_v26  ;;  %v491_v35 = vmul.f32 %v1368_v29, %v1368_v29  ;;  %499 = vadd.xlane.f32.xlu1 %v498_v32 }
 0x130   : > { %v1375_v36 = vsub.f32 %v1282_v44, %v463_v33  ;;  %v1378_v37 = vsub.f32 %v1279_v41, %v463_v33  ;;  %v510_v38 = vadd.f32 %v491_v35, %v490_v34 }
 0x132   : > { %v492_v39 = vmul.f32 %v1375_v36, %v1375_v36  ;;  %v493_v40 = vmul.f32 %v1378_v37, %v1378_v37  ;;  %511 = vadd.xlane.f32.xlu1 %v510_v38 }
 0x134   : > { %v513_v42 = vadd.f32 %v493_v40, %v492_v39  ;;  %v444_v45 = vpop.xlane.xlu0 %443 }
 0x135   : > { %v441_v43 = vpop.xlane.xlu1 %440  ;;  %v461_v47 = vmul.f32 0.00390625, %v444_v45 }
 0x136   : > { %v460_v46 = vmul.f32 0.00390625, %v441_v43  ;;  %514 = vadd.xlane.f32.xlu0 %v513_v42 }
 0x137   : > { %v1391_v48 = vsub.f32 %v1291_v54, %v461_v47  ;;  %v1394_v49 = vsub.f32 %v1298_v57, %v461_v47  ;;  %v1030_v57 = vld [vmem:[%s1542_s4 + $0x58] sm:$0xff]  }
 0x138   : > { %v1385_v44 = vsub.f32 %v1294_v55, %v460_v46  ;;  %v1388_v41 = vsub.f32 %v1301_v58, %v460_v46  ;;  %v456_v51 = vpop.xlane.xlu0 %455  ;;  %932 = vmatprep.subr.bf16.mxu0 %v1030_v57  ;;  %969 = vmatprep.subr.bf16.mxu1 %v1030_v57 }
 0x139   : > { %v453_v50 = vpop.xlane.xlu1 %452  ;;  %v465_v53 = vmul.f32 0.00390625, %v456_v51  ;;  %v488_v58 = vmul.f32 %v1391_v48, %v1391_v48  ;;  %v489_v54 = vmul.f32 %v1394_v49, %v1394_v49  ;;  %933 = vmatpush3.bf16.msra.mxu0 %v1031_v63  ;;  %977 = vmatpush3.bf16.msra.mxu1 %v1031_v63 }
 0x13a   : > { %v464_v52 = vmul.f32 0.00390625, %v453_v50  ;;  %v486_v56 = vmul.f32 %v1385_v44, %v1385_v44  ;;  %v487_v55 = vmul.f32 %v1388_v41, %v1388_v41  ;;  %934 = vmatprep.subr.bf16.mxu0 %v1032_v6  ;;  %970 = vmatprep.subr.bf16.mxu1 %v1032_v6 }
 0x13b   : > { %v1414_v61 = vsub.f32 %v1311_v2, %v465_v53  ;;  %v1417_v62 = vsub.f32 %v1317_v4, %v465_v53  ;;  %v507_v1 = vadd.f32 %v489_v54, %v488_v58 }
 0x13c   : > { %v1408_v59 = vsub.f32 %v1314_v3, %v464_v52  ;;  %v1411_v60 = vsub.f32 %v1320_v5, %v464_v52  ;;  %v504_v0 = vadd.f32 %v487_v55, %v486_v56 }
 0x13d   : > { %v496_v2 = vmul.f32 %v1414_v61, %v1414_v61  ;;  %v497_v4 = vmul.f32 %v1417_v62, %v1417_v62  ;;  %508 = vadd.xlane.f32.xlu0 %v507_v1  ;;  %935 = vmatpush3.bf16.msra.mxu0 %v1033_v9 }
 0x13e   : > { %v494_v3 = vmul.f32 %v1408_v59, %v1408_v59  ;;  %v495_v5 = vmul.f32 %v1411_v60, %v1411_v60  ;;  %505 = vadd.xlane.f32.xlu1 %v504_v0  ;;  %978 = vmatpush3.bf16.msra.mxu1 %v1033_v9 }
 0x13f   : > { %v519_v8 = vadd.f32 %v497_v4, %v496_v2  ;;  %936 = vmatprep.subr.bf16.mxu0 %v1034_v10  ;;  %971 = vmatprep.subr.bf16.mxu1 %v1034_v10 }
 0x140   : > { %v516_v7 = vadd.f32 %v495_v5, %v494_v3 }
 0x141   : > { %520 = vadd.xlane.f32.xlu0 %v519_v8  ;;  %937 = vmatpush3.bf16.msra.mxu0 %v1035_v11 }
 0x142   : > { %517 = vadd.xlane.f32.xlu1 %v516_v7  ;;  %979 = vmatpush3.bf16.msra.mxu1 %v1035_v11 }
 0x143   : > { %938 = vmatprep.subr.bf16.mxu0 %v1036_v12  ;;  %972 = vmatprep.subr.bf16.mxu1 %v1036_v12 }
 0x145   : > { %939 = vmatpush3.bf16.msra.mxu0 %v1037_v13 }
 0x146   : > { %980 = vmatpush3.bf16.msra.mxu1 %v1037_v13  ;;  %940 = vmatprep.subr.bf16.mxu0 %v1038_v14 }
 0x147   : > { %973 = vmatprep.subr.bf16.mxu1 %v1038_v14 }
 0x149   : > { %941 = vmatpush3.bf16.msra.mxu0 %v1039_v15 }
 0x14a   : > { %981 = vmatpush3.bf16.msra.mxu1 %v1039_v15 }
 0x1ba   : > { %v503_v16 = vpop.xlane.xlu0 %502 }
 0x1bb   : > { %v500_v17 = vpop.xlane.xlu1 %499  ;;  %v523_v22 = vmul.f32 0.00390625, %v503_v16 }
 0x1bc   : > { %v522_v23 = vmul.f32 0.00390625, %v500_v17 }
 0x1bd   : > { %v531_v24 = vadd.f32 1e-05, %v523_v22 }
 0x1be   : > { %v530_v25 = vadd.f32 1e-05, %v522_v23 }
 0x1bf   : > { %1040 = vrsqrt.f32 %v531_v24  ;;  %v512_v27 = vpop.xlane.xlu1 %511 }
 0x1c0   : > { %1042 = vrsqrt.f32 %v530_v25  ;;  %v526_v28 = vmul.f32 0.00390625, %v512_v27 }
 0x1c2   : > { %v534_v30 = vadd.f32 1e-05, %v526_v28 }
 0x1c3   : > { %v515_v31 = vpop.xlane.xlu0 %514 }
 0x1c4   : > { %v527_v32 = vmul.f32 0.00390625, %v515_v31  ;;  %1044 = vrsqrt.f32 %v534_v30 }
 0x1c6   : > { %v535_v33 = vadd.f32 1e-05, %v527_v32 }
 0x1c8   : > { %1046 = vrsqrt.f32 %v535_v33 }
 0x1c9   : > { %v1041_v34 = vpop.eup %1040 }
 0x1ca   : > { %v1043_v35 = vpop.eup %1042  ;;  %v549_v38 = vmul.f32 %v1041_v34, %v1348_v19  ;;  %v548_v39 = vmul.f32 %v1041_v34, %v1345_v18  ;;  %v509_v42 = vpop.xlane.xlu0 %508 }
 0x1cb   : > { %v506_v40 = vpop.xlane.xlu1 %505  ;;  %v547_v43 = vmul.f32 %v1043_v35, %v1354_v21  ;;  %v546_v45 = vmul.f32 %v1043_v35, %v1351_v20  ;;  %v525_v47 = vmul.f32 0.00390625, %v509_v42 }
 0x1cc   : > { %v524_v46 = vmul.f32 0.00390625, %v506_v40 }
 0x1cd   : > { %v563_v50 = vpack.c.bf16 %v549_v38, %v547_v43  ;;  %v562_v51 = vpack.c.bf16 %v548_v39, %v546_v45  ;;  %v533_v56 = vadd.f32 1e-05, %v525_v47 }
 0x1ce   : > { %v1045_v52 = vpop.eup %1044  ;;  %v532_v53 = vadd.f32 1e-05, %v524_v46  ;;  %v521_v58 = vpop.xlane.xlu0 %520 }
 0x1cf   : > { %v518_v55 = vpop.xlane.xlu1 %517  ;;  %737 = vmatprep.mubr.bf16.mxu0 %v563_v50  ;;  %v529_v54 = vmul.f32 0.00390625, %v521_v58  ;;  %v555_v21 = vmul.f32 %v1045_v52, %v1368_v29  ;;  %v554_v20 = vmul.f32 %v1045_v52, %v1365_v26 }
 0x1d0   : > { %1048 = vrsqrt.f32 %v532_v53  ;;  %v528_v19 = vmul.f32 0.00390625, %v518_v55  ;;  %738 = vmatmul.mubr.bf16.vlgmr.msra.gmra.mrb[0].mxu0 %v562_v51 }
 0x1d1   : > { %1050 = vrsqrt.f32 %v533_v56  ;;  %v537_v63 = vadd.f32 1e-05, %v529_v54 }
 0x1d2   : > { %v1047_v18 = vpop.eup %1046  ;;  %v536_v57 = vadd.f32 1e-05, %v528_v19 }
 0x1d3   : > { %v557_v0 = vmul.f32 %v1047_v18, %v1378_v37  ;;  %v556_v1 = vmul.f32 %v1047_v18, %v1375_v36 }
 0x1d4   : > { %1052 = vrsqrt.f32 %v536_v57 }
 0x1d5   : > { %v567_v3 = vpack.c.bf16 %v557_v0, %v555_v21  ;;  %v566_v5 = vpack.c.bf16 %v556_v1, %v554_v20  ;;  %1054 = vrsqrt.f32 %v537_v63 }
 0x1d7   : > { %753 = vmatprep.mubr.bf16.mxu1 %v567_v3 }
 0x1d8   : > { %754 = vmatmul.mubr.bf16.vlgmr.msra.gmra.mrb[0].mxu1 %v566_v5 }
 0x1da   : > { %v1049_v2 = vpop.eup %1048 }
 0x1db   : > { %v1051_v4 = vpop.eup %1050  ;;  %v551_v6 = vmul.f32 %v1049_v2, %v1388_v41  ;;  %v550_v29 = vmul.f32 %v1049_v2, %v1385_v44 }
 0x1dc   : > { %v553_v26 = vmul.f32 %v1051_v4, %v1394_v49  ;;  %v552_v7 = vmul.f32 %v1051_v4, %v1391_v48 }
 0x1de   : > { %v1053_v37 = vpop.eup %1052  ;;  %v565_v36 = vpack.c.bf16 %v553_v26, %v551_v6  ;;  %v564_v8 = vpack.c.bf16 %v552_v7, %v550_v29 }
 0x1df   : > { %v1055_v9 = vpop.eup %1054  ;;  %v559_v10 = vmul.f32 %v1053_v37, %v1411_v60  ;;  %v558_v11 = vmul.f32 %v1053_v37, %v1408_v59  ;;  %v903_v60 = vld [vmem:[%s1543_s5] ss:$0 sm:$0xff] }
 0x1e0   : > { %745 = vmatprep.mubr.bf16.mxu0 %v565_v36  ;;  %v561_v12 = vmul.f32 %v1055_v9, %v1417_v62  ;;  %v560_v41 = vmul.f32 %v1055_v9, %v1414_v61 }
 0x1e1   : > { %746 = vmatmul.mubr.bf16.gmra.mrb[4].mxu0 %v564_v8 }
 0x1e2   : > { %v569_v44 = vpack.c.bf16 %v561_v12, %v559_v10  ;;  %v568_v49 = vpack.c.bf16 %v560_v41, %v558_v11 }
 0x1e4   : > { %761 = vmatprep.mubr.bf16.mxu1 %v569_v44 }
 0x1e5   : > { %762 = vmatmul.mubr.bf16.gmra.mrb[4].mxu1 %v568_v49 }
 0x2a3   : > { %v942_v48 = vpop.f32.mrb[0].mxu0 }
 0x2a4   : > { %v943_v13 = vpop.f32.mrb[1].mxu0 }
 0x2a5   : > { %v944_v59 = vadd.f32 %v943_v13, %v942_v48  ;;  %v945_v14 = vpop.f32.mrb[2].mxu0 }
 0x2a6   : > { %v946_v15 = vpop.f32.mrb[3].mxu0 }
 0x2a7   : > { %v740_v62 = vadd.f32 %v944_v59, %v903_v60  ;;  %v947_v16 = vadd.f32 %v946_v15, %v945_v14 }
 0x2a9   : > { %770 = vst [vmem:[%s1476_s15] sm:$0xff] %v740_v62  ;;  %v743_v61 = vadd.f32 %v947_v16, %v903_v60 }
 0x2ab   : > { %v954_v17 = vpop.f32.mrb[0].mxu1  ;;  %771 = vst [vmem:[%s1476_s15 + $0x8] sm:$0xff] %v743_v61 }
 0x2ac   : > { %v955_v22 = vpop.f32.mrb[1].mxu1 }
 0x2ad   : > { %v956_v23 = vadd.f32 %v955_v22, %v954_v17  ;;  %v957_v24 = vpop.f32.mrb[2].mxu1 }
 0x2ae   : > { %v958_v25 = vpop.f32.mrb[3].mxu1 }
 0x2af   : > { %v756_v27 = vadd.f32 %v956_v23, %v903_v60  ;;  %v959_v28 = vadd.f32 %v958_v25, %v957_v24 }
 0x2b1   : > { %774 = vst [vmem:[%s1476_s15 + $0x20] sm:$0xff] %v756_v27  ;;  %v759_v30 = vadd.f32 %v959_v28, %v903_v60 }
 0x2b3   : > { %775 = vst [vmem:[%s1476_s15 + $0x28] sm:$0xff] %v759_v30 }
 0x2b4   : > { %v948_v31 = vpop.f32.mrb[4].mxu0 }
 0x2b5   : > { %v949_v32 = vpop.f32.mrb[5].mxu0 }
 0x2b6   : > { %v950_v33 = vadd.f32 %v949_v32, %v948_v31  ;;  %v951_v34 = vpop.f32.mrb[6].mxu0 }
 0x2b7   : > { %v952_v35 = vpop.f32.mrb[7].mxu0 }
 0x2b8   : > { %v748_v38 = vadd.f32 %v950_v33, %v903_v60  ;;  %v953_v39 = vadd.f32 %v952_v35, %v951_v34  ;;  %v960_v40 = vpop.f32.mrb[4].mxu1 }
 0x2b9   : > { %v961_v42 = vpop.f32.mrb[5].mxu1 }
 0x2ba   : > { %772 = vst [vmem:[%s1476_s15 + $0x10] sm:$0xff] %v748_v38  ;;  %v751_v43 = vadd.f32 %v953_v39, %v903_v60  ;;  %v962_v45 = vadd.f32 %v961_v42, %v960_v40  ;;  %v963_v46 = vpop.f32.mrb[6].mxu1 }
 0x2bb   : > { %v964_v47 = vpop.f32.mrb[7].mxu1 }
 0x2bc   : > { %773 = vst [vmem:[%s1476_s15 + $0x18] sm:$0xff] %v751_v43  ;;  %v764_v50 = vadd.f32 %v962_v45, %v903_v60  ;;  %v965_v51 = vadd.f32 %v964_v47, %v963_v46 }
 0x2be   : > { %776 = vst [vmem:[%s1476_s15 + $0x30] sm:$0xff] %v764_v50  ;;  %v767_v52 = vadd.f32 %v965_v51, %v903_v60 }
 0x2c0   : > { %777 = vst [vmem:[%s1476_s15 + $0x38] sm:$0xff] %v767_v52 }
 0x2c1   : > { %1069 = shalt.err (!%p1066_p3)
}
 0x2c2   : > { %s1070_s10 = scalar_lea.hbm %s1489_s20, 1024  ;;  %s1074_s13 = scalar_lea.hbm %s1544_s6, 2048 }
 0x2c3   : > { %p1071_p4 = scmp.ne.s32.totalorder %s1489_s20, %s1070_s10  ;;  %p1075_p9 = scmp.lt.u32.totalorder %s1489_s20, %s1544_s6 }
 0x2c4   : > { %p1076_p10 = scmp.lt.u32.totalorder %s1074_s13, %s1070_s10  ;;  %p1078_p12 = scmp.lt.u32.totalorder %s1070_s10, %s1489_s20 }
 0x2c5   : > { %p1072_p7 = pnand %p1071_p4, %p1197_p5 }
 0x2c6   : > { %p1077_p11 = por %p1076_p10, %p1075_p9 }
 0x2c7   : > { %p1073_p8 = pneg %p1072_p7 }
 0x2c8   : > { %p1079_p13 = por %p1078_p12, %p1077_p11 }
 0x2ca   : > { %p1080_p0 = pnand %p1079_p13, %p1073_p8 }
 0x2cc   : > { %1083 = shalt.err (!%p1080_p0)
}
 0x2cd   : > { %s1122_s16 = smov 128   ;;  %s1123_s18 = smov 8  }
 0x2ce   : > { %982 = dma.vmem_to_hbm [thread:$0]  (%p1197_p5), %s1491_s17, 1024, %s1489_s20, %s1497_s25, %s1122_s16, %s1122_s16, %s1123_s18  }
 0x2cf PF: > { %p988_p1 = scmp.ge.s32.totalorder %s1118_s24, 2  ;;  %s807_s19 = sand.u32 1, %s1106_s21  }
 0x2d0   : > { %s808_s26 = scalar_lea.sflag [#allocation3], %s807_s19 }
 0x2d1   : > { %p985_p2 = pnand %p988_p1, %p1201_p6 }
 0x2d3   : > { %1101 = dma.done.wait (!%p985_p2), %s808_s26, 1024  }
 0x2d4   : > { %1103 = vsyncadd (!%p985_p2), %s808_s26, 4294966272  ;;  %p16_p3 = scmp.ge.s32.totalorder %s1184_s27, 4   ;;  %s1547_s21 = smov %s1110_s22 }
 0x2d5   : > { %s1548_s22 = smov %s1114_s23  ;;  %s1549_s23 = smov %s1195_s30 }
 0x2d6   : > { %s1550_s24 = smov %s1184_s27  ;;  %18 = sbr.rel (!%p16_p3) target bundleno = 3 (0x3), region = 88 }
 0x2dd   :  { %813 = vsyncpa [#allocation3], 1 }
 0x2de   :  { %815 = vsyncpa [#allocation3 + $0x1], 1 }

</bundles_post_ra>
